<compile_context>
chip_gen: v7x
topology: tpu7x:2x2x1
jax: 0.10.0
libtpu: 0.0.40
codegen_flags: <defaults>
</compile_context>

<pallas_src>
import functools

import jax
import jax.numpy as jnp
from jax.experimental import pallas as pl
from jax.experimental.pallas import tpu as pltpu

HIDDEN = 128  # hidden width of the MLP (nn.Linear(1, 128))


def mlp_kernel(x_ref, p_ref, o_ref):
    # x_ref: (1, TB)      batch on lanes (lane-dense)
    # p_ref: (128, 4)     packed columns [w1 | b1 | w2 | b2], features on sublanes
    # o_ref: (1, TB)      lane-dense output
    x = x_ref[...]                      # (1, TB)
    p = p_ref[...]                      # (128, 4)
    w1 = p[:, 0:1]                      # (128, 1)
    b1 = p[:, 1:2]                      # (128, 1)
    w2 = p[:, 2:3]                      # (128, 1)
    b2 = p[0:1, 3:4]                    # (1, 1)

    # Linear(1, 128): K=1 matmul == outer product -> pure VPU broadcast multiply.
    h = jnp.maximum(x * w1 + b1, 0.0)                       # (128, TB)
    # Linear(128, 1): N=1 matmul -> VPU multiply + sublane (XLU) reduction.
    out = jnp.sum(h * w2, axis=0, keepdims=True) + b2       # (1, TB)
    o_ref[...] = out.astype(o_ref.dtype)


def _round_up(n, m):
    return ((n + m - 1) // m) * m


@functools.partial(jax.jit, static_argnames=("tb",))
def network_forward(x, w1, b1, w2, b2, *, tb=256):
    """Pallas forward pass of Linear(1,128) -> ReLU -> Linear(128,1).

    x : (B, 1) float32
    w1: (1, 128), b1: (1, 128), w2: (128, 1), b2: (1, 1)
    returns (B, 1) float32
    """
    assert tb % 128 == 0, "tile must be a multiple of the 128-lane width"
    B = x.shape[0]

    # Pack all parameters into a single (128, 4) array -> one DMA descriptor.
    params = jnp.concatenate(
        [
            w1.reshape(HIDDEN, 1),                                # layer-1 weight
            b1.reshape(HIDDEN, 1),                                # layer-1 bias
            w2.reshape(HIDDEN, 1),                                # layer-2 weight
            jnp.broadcast_to(b2.reshape(1, 1), (HIDDEN, 1)),      # layer-2 bias
        ],
        axis=1,
    ).astype(jnp.float32)

    # Put the batch on the lane axis and zero-pad to a multiple of the tile.
    bp = _round_up(max(B, 1), tb)
    x_lanes = jnp.zeros((1, bp), jnp.float32).at[0, :B].set(x.reshape(B))

    out = pl.pallas_call(
        mlp_kernel,
        out_shape=jax.ShapeDtypeStruct((1, bp), jnp.float32),
        grid=(bp // tb,),
        in_specs=[
            pl.BlockSpec((1, tb), lambda i: (0, i)),        # x tile (lane-dense)
            pl.BlockSpec((HIDDEN, 4), lambda i: (0, 0)),    # packed params (resident)
        ],
        out_specs=pl.BlockSpec((1, tb), lambda i: (0, i)),  # lane-dense output
        compiler_params=pltpu.CompilerParams(
            dimension_semantics=("parallel",),  # shard batch over 2 TCs on v7x
        ),
    )(x_lanes, params)

    return out[0, :B].reshape(B, 1)


def init_params(key):
    """Deterministic init mirroring PyTorch nn.Linear defaults:
    U(-1/sqrt(fan_in), 1/sqrt(fan_in)) for both weight and bias."""
    k1, k2, k3, k4 = jax.random.split(key, 4)
    # Linear(1, 128): fan_in = 1
    bound1 = 1.0
    w1 = jax.random.uniform(k1, (1, HIDDEN), jnp.float32, -bound1, bound1)
    b1 = jax.random.uniform(k2, (1, HIDDEN), jnp.float32, -bound1, bound1)
    # Linear(128, 1): fan_in = 128
    bound2 = 1.0 / (HIDDEN ** 0.5)
    w2 = jax.random.uniform(k3, (HIDDEN, 1), jnp.float32, -bound2, bound2)
    b2 = jax.random.uniform(k4, (1, 1), jnp.float32, -bound2, bound2)
    return w1, b1, w2, b2


if __name__ == "__main__":
    key = jax.random.PRNGKey(0)
    k_params, k_x = jax.random.split(key)

    w1, b1, w2, b2 = init_params(k_params)
    # Small batch of scalar inputs, matching the module's Linear(1, ...) signature.
    x = jax.random.normal(k_x, (8, 1), jnp.float32)

    out = network_forward(x, w1, b1, w2, b2)
    out = jax.block_until_ready(out)

    # Reference check in plain JAX (same math as the PyTorch module).
    ref = jnp.maximum(x @ w1 + b1, 0.0) @ w2 + b2
    assert out.shape == (8, 1)
    assert jnp.allclose(out, ref, atol=1e-5, rtol=1e-5)

    print("KERNEL_OK")
</pallas_src>

<mosaic_0001>
module attributes {stable_mosaic.version = 11 : i64} {
  func.func @mlp_kernel(%arg0: i32, %arg1: memref<1x256xf32, #tpu.memory_space<vmem>>, %arg2: memref<128x4xf32, #tpu.memory_space<vmem>>, %arg3: memref<1x256xf32, #tpu.memory_space<vmem>>) attributes {dimension_semantics = [#tpu.dimension_semantics<parallel>], iteration_bounds = array<i64: 1>, scalar_prefetch = 0 : i64, scratch_operands = 0 : i64, tpu.core_type = #tpu.core_type<tc>, window_params = [{transform_indices = @transform_0, window_bounds = array<i64: 1, 256>}, {pipeline_mode = #tpu.pipeline_mode<synchronous>, transform_indices = @transform_1, window_bounds = array<i64: 128, 4>}, {transform_indices = @transform_2, window_bounds = array<i64: 1, 256>}]} {
    %c0 = arith.constant 0 : index
    %c0_0 = arith.constant 0 : index
    %0 = vector.load %arg1[%c0, %c0_0] : memref<1x256xf32, #tpu.memory_space<vmem>>, vector<1x256xf32>
    %c0_1 = arith.constant 0 : index
    %c0_2 = arith.constant 0 : index
    %1 = vector.load %arg2[%c0_1, %c0_2] : memref<128x4xf32, #tpu.memory_space<vmem>>, vector<128x4xf32>
    %2 = vector.extract_strided_slice %1 {offsets = [0, 0], sizes = [128, 1], strides = [1, 1]} : vector<128x4xf32> to vector<128x1xf32>
    %3 = vector.extract_strided_slice %1 {offsets = [0, 1], sizes = [128, 1], strides = [1, 1]} : vector<128x4xf32> to vector<128x1xf32>
    %4 = vector.extract_strided_slice %1 {offsets = [0, 2], sizes = [128, 1], strides = [1, 1]} : vector<128x4xf32> to vector<128x1xf32>
    %5 = vector.extract_strided_slice %1 {offsets = [0, 3], sizes = [1, 1], strides = [1, 1]} : vector<128x4xf32> to vector<1x1xf32>
    %6 = vector.broadcast %0 : vector<1x256xf32> to vector<128x256xf32>
    %7 = vector.broadcast %2 : vector<128x1xf32> to vector<128x256xf32>
    %8 = arith.mulf %6, %7 : vector<128x256xf32>
    %9 = vector.broadcast %3 : vector<128x1xf32> to vector<128x256xf32>
    %10 = arith.addf %8, %9 : vector<128x256xf32>
    %cst = arith.constant 0.000000e+00 : f32
    %11 = vector.broadcast %cst : f32 to vector<128x256xf32>
    %12 = arith.maximumf %10, %11 : vector<128x256xf32>
    %13 = vector.broadcast %4 : vector<128x1xf32> to vector<128x256xf32>
    %14 = arith.mulf %12, %13 : vector<128x256xf32>
    %cst_3 = arith.constant dense<0.000000e+00> : vector<256xf32>
    %15 = vector.multi_reduction <add>, %14, %cst_3 [0] : vector<128x256xf32> to vector<256xf32>
    %16 = vector.shape_cast %15 : vector<256xf32> to vector<1x256xf32>
    %17 = vector.broadcast %5 : vector<1x1xf32> to vector<1x256xf32>
    %18 = arith.addf %16, %17 : vector<1x256xf32>
    %c0_4 = arith.constant 0 : index
    %c0_5 = arith.constant 0 : index
    %19 = vector.load %arg3[%c0_4, %c0_5] : memref<1x256xf32, #tpu.memory_space<vmem>>, vector<1x256xf32>
    tpu.vector_store %arg3[%c0_4, %c0_5], %18 {strides = array<i32>} : memref<1x256xf32, #tpu.memory_space<vmem>>, vector<1x256xf32>,
    return
  }
  func.func @transform_0(%arg0: i32) -> (i32, i32) {
    %c0_i32 = arith.constant 0 : i32
    %c0_i32_0 = arith.constant 0 : i32
    return %c0_i32, %arg0 : i32, i32
  }
  func.func @transform_1(%arg0: i32) -> (i32, i32) {
    %c0_i32 = arith.constant 0 : i32
    %c0_i32_0 = arith.constant 0 : i32
    %c0_i32_1 = arith.constant 0 : i32
    return %c0_i32, %c0_i32_0 : i32, i32
  }
  func.func @transform_2(%arg0: i32) -> (i32, i32) {
    %c0_i32 = arith.constant 0 : i32
    %c0_i32_0 = arith.constant 0 : i32
    return %c0_i32, %arg0 : i32, i32
  }
}

</mosaic_0001>

<bundles_post_ra>
// kernel: network_forward.1
= control target key start
LH: loop header
LB: loop body
LE: loop exit
PB: predicated region body
PF: predicated region fallthrough
CT: control target
= control target key end

     0   :  { %v473_v0 = vmov 0   ;;  %v474_v17 = vmov 1   ;;  %v475_v18 = vmov 2   ;;  %v476_v19 = vmov 3   ;;  %s656_s1 = inlined_call_operand.vmem [shape: f32[128,4], index: 1, kind: input, shape index: {}]   ;;  %s657_s0 = inlined_call_operand.vmem [shape: f32[1,256], index: 0, kind: input, shape index: {}]   ;;  %s658_s2 = inlined_call_operand.vmem [shape: f32[1,256], index: 2, kind: output, shape index: {}]  }
   0x1   :  { %456 = vset.pattern.permute.xlu1 %v473_v0  ;;  %455 = vset.pattern.permute.xlu0 %v473_v0  ;;  %v14_v1 = vld [vmem:[%s656_s1 + $0x10] sm:$0xff]  ;;  %v499_v2 = vld [vmem:[%s656_s1] sm:$0xff]  ;;  %v15_v3 = vld [vmem:[%s656_s1 + $0x18] sm:$0xff]  ;;  %v29_v34 = vlaneseq }
   0x2   :  { %51 = vperm.xlu1 %456, %v14_v1   ;;  %41 = vperm.xlu0 %455, %v499_v2   ;;  %v13_v4 = vld [vmem:[%s656_s1 + $0x8] sm:$0xff]  ;;  %v16_v6 = vld [vmem:[%s656_s1 + $0x20] sm:$0xff]  ;;  %v19_v7 = vld [vmem:[%s656_s1 + $0x38] sm:$0xff] }
   0x3   :  { %v17_v5 = vld [vmem:[%s656_s1 + $0x28] sm:$0xff]  ;;  %v18_v8 = vld [vmem:[%s656_s1 + $0x30] sm:$0xff]  ;;  %v20_v10 = vld [vmem:[%s656_s1 + $0x40] sm:$0xff]  ;;  %v572_v37 = vshrl.u32 %v29_v34, 7  ;;  %vm443_vm0 = vcmp.lt.s32.totalorder %v29_v34, 256 }
   0x4   :  { %v21_v9 = vld [vmem:[%s656_s1 + $0x48] sm:$0xff]  ;;  %v23_v11 = vld [vmem:[%s656_s1 + $0x58] sm:$0xff]  ;;  %v22_v12 = vld [vmem:[%s656_s1 + $0x50] sm:$0xff] }
   0x5   :  { %v25_v13 = vld [vmem:[%s656_s1 + $0x68] sm:$0xff]  ;;  %v24_v14 = vld [vmem:[%s656_s1 + $0x60] sm:$0xff]  ;;  %v27_v15 = vld [vmem:[%s656_s1 + $0x78] sm:$0xff]  ;;  %v31_v40 = vsub.s32 0, %v572_v37  ;;  %v35_v41 = vsub.s32 1, %v572_v37 }
   0x6   :  { %56 = vperm.xlu1 %456, %v15_v3   ;;  %46 = vperm.xlu0 %455, %v13_v4   ;;  %v26_v16 = vld [vmem:[%s656_s1 + $0x70] sm:$0xff]  ;;  %v11_v42 = vld [vmem:[%s657_s0] sm:$0x3] }
   0x7   :  { %v581_v45 = vrot.slane %v11_v42, %v31_v40  ;;  %v583_v46 = vrot.slane %v11_v42, %v35_v41 }
   0xa   :  { %66 = vperm.xlu1 %456, %v17_v5   ;;  %61 = vperm.xlu0 %455, %v16_v6  }
   0xe   :  { %76 = vperm.xlu1 %456, %v19_v7   ;;  %71 = vperm.xlu0 %455, %v18_v8  }
  0x12   :  { %86 = vperm.xlu1 %456, %v21_v9   ;;  %81 = vperm.xlu0 %455, %v20_v10  }
  0x16   :  { %96 = vperm.xlu1 %456, %v23_v11   ;;  %91 = vperm.xlu0 %455, %v22_v12  }
  0x1a   :  { %106 = vperm.xlu1 %456, %v25_v13   ;;  %101 = vperm.xlu0 %455, %v24_v14  }
  0x1e   :  { %116 = vperm.xlu1 %456, %v27_v15   ;;  %111 = vperm.xlu0 %455, %v26_v16  }
  0x22   :  { %457 = vset.pattern.permute.xlu1 %v474_v17  ;;  %459 = vset.pattern.permute.xlu0 %v475_v18 }
  0x23   :  { %156 = vperm.xlu1 %457, %v13_v4   ;;  %284 = vperm.xlu0 %459, %v13_v4  }
  0x27   :  { %160 = vperm.xlu1 %457, %v14_v1   ;;  %296 = vperm.xlu0 %459, %v16_v6  }
  0x2b   :  { %458 = vset.pattern.permute.xlu1 %v475_v18  ;;  %308 = vperm.xlu0 %459, %v19_v7  }
  0x2c   :  { %280 = vperm.xlu1 %458, %v499_v2  }
  0x2f   :  { %320 = vperm.xlu0 %459, %v22_v12  }
  0x30   :  { %460 = vset.pattern.permute.xlu1 %v474_v17 }
  0x31   :  { %168 = vperm.xlu1 %460, %v16_v6  }
  0x33   :  { %467 = vset.pattern.permute.xlu0 %v474_v17 }
  0x34   :  { %152 = vperm.xlu0 %467, %v499_v2  }
  0x35   :  { %461 = vset.pattern.permute.xlu1 %v475_v18 }
  0x36   :  { %288 = vperm.xlu1 %461, %v14_v1  }
  0x38   :  { %164 = vperm.xlu0 %467, %v15_v3  }
  0x3a   :  { %292 = vperm.xlu1 %461, %v15_v3  }
  0x3c   :  { %172 = vperm.xlu0 %467, %v17_v5  }
  0x3e   :  { %462 = vset.pattern.permute.xlu1 %v474_v17 }
  0x3f   :  { %176 = vperm.xlu1 %462, %v18_v8  }
  0x40   :  { %184 = vperm.xlu0 %467, %v20_v10  }
  0x43   :  { %180 = vperm.xlu1 %462, %v19_v7  }
  0x44   :  { %196 = vperm.xlu0 %467, %v23_v11  }
  0x47   :  { %463 = vset.pattern.permute.xlu1 %v475_v18 }
  0x48   :  { %300 = vperm.xlu1 %463, %v17_v5   ;;  %208 = vperm.xlu0 %467, %v26_v16  }
  0x4c   :  { %304 = vperm.xlu1 %463, %v18_v8   ;;  %470 = vset.pattern.permute.xlu0 %v475_v18 }
  0x4d   :  { %332 = vperm.xlu0 %470, %v25_v13  }
  0x50   :  { %464 = vset.pattern.permute.xlu1 %v474_v17 }
  0x51   :  { %188 = vperm.xlu1 %464, %v21_v9   ;;  %472 = vset.pattern.permute.xlu0 %v476_v19 }
  0x52   :  { %418 = vperm.xlu0 %472, %v499_v2  }
  0x55   :  { %192 = vperm.xlu1 %464, %v22_v12  }
  0x59   :  { %465 = vset.pattern.permute.xlu1 %v475_v18 }
  0x5a   :  { %312 = vperm.xlu1 %465, %v20_v10  }
  0x5e   :  { %316 = vperm.xlu1 %465, %v21_v9  }
  0x62   :  { %466 = vset.pattern.permute.xlu1 %v474_v17 }
  0x63   :  { %200 = vperm.xlu1 %466, %v24_v14  }
  0x67   :  { %204 = vperm.xlu1 %466, %v25_v13  }
  0x6b   :  { %468 = vset.pattern.permute.xlu1 %v475_v18 }
  0x6c   :  { %324 = vperm.xlu1 %468, %v23_v11  }
  0x70   :  { %328 = vperm.xlu1 %468, %v24_v14  }
  0x74   :  { %469 = vset.pattern.permute.xlu1 %v474_v17 }
  0x75   :  { %212 = vperm.xlu1 %469, %v27_v15  }
  0x79   :  { %471 = vset.pattern.permute.xlu1 %v475_v18 }
  0x7a   :  { %336 = vperm.xlu1 %471, %v26_v16  }
  0x7e   :  { %340 = vperm.xlu1 %471, %v27_v15  }
  0x81   :  { %v52_v20 = vpop.permute.xlu1 %51  ;;  %v42_v21 = vpop.permute.xlu0 %41 }
  0x82   :  { %v123_v55 = vmul.f32 %v52_v20, %v581_v45  ;;  %v124_v56 = vmul.f32 %v52_v20, %v583_v46  ;;  %v119_v57 = vmul.f32 %v42_v21, %v581_v45  ;;  %v120_v58 = vmul.f32 %v42_v21, %v583_v46 }
  0x85   :  { %v57_v22 = vpop.permute.xlu1 %56  ;;  %v47_v23 = vpop.permute.xlu0 %46 }
  0x86   :  { %v121_v48 = vmul.f32 %v47_v23, %v581_v45  ;;  %v122_v49 = vmul.f32 %v47_v23, %v583_v46  ;;  %v125_v3 = vmul.f32 %v57_v22, %v581_v45  ;;  %v126_v4 = vmul.f32 %v57_v22, %v583_v46 }
  0x89   :  { %v547_v24 = vpop.permute.xlu1 %66  ;;  %v549_v25 = vpop.permute.xlu0 %61 }
  0x8a   :  { %v127_v22 = vmul.f32 %v549_v25, %v581_v45 }
  0x8d   :  { %v551_v26 = vpop.permute.xlu1 %76  ;;  %v553_v27 = vpop.permute.xlu0 %71 }
  0x91   :  { %v555_v28 = vpop.permute.xlu1 %86  ;;  %v557_v29 = vpop.permute.xlu0 %81 }
  0x95   :  { %v559_v30 = vpop.permute.xlu1 %96  ;;  %v561_v31 = vpop.permute.xlu0 %91 }
  0x99   :  { %v563_v32 = vpop.permute.xlu1 %106  ;;  %v565_v33 = vpop.permute.xlu0 %101 }
  0x9d   :  { %v567_v35 = vpop.permute.xlu1 %116  ;;  %v569_v36 = vpop.permute.xlu0 %111 }
  0xa2   :  { %v157_v38 = vpop.permute.xlu1 %156  ;;  %v285_v39 = vpop.permute.xlu0 %284 }
  0xa3   :  { %v217_v52 = vadd.f32 %v157_v38, %v121_v48  ;;  %v218_v53 = vadd.f32 %v157_v38, %v122_v49  ;;  %v128_v38 = vmul.f32 %v549_v25, %v583_v46 }
  0xa5   :  { %v249_v59 = vmax.f32 %v217_v52, 0.0  ;;  %v250_v60 = vmax.f32 %v218_v53, 0.0 }
  0xa6   :  { %v161_v43 = vpop.permute.xlu1 %160  ;;  %v579_v44 = vpop.permute.xlu0 %296 }
  0xa7   :  { %v219_v61 = vadd.f32 %v161_v43, %v123_v55  ;;  %v220_v62 = vadd.f32 %v161_v43, %v124_v56  ;;  %v345_v7 = vmul.f32 %v285_v39, %v249_v59  ;;  %v346_v8 = vmul.f32 %v285_v39, %v250_v60 }
  0xa8   :  { %v129_v55 = vmul.f32 %v547_v24, %v581_v45  ;;  %v130_v56 = vmul.f32 %v547_v24, %v583_v46 }
  0xa9   :  { %v251_v9 = vmax.f32 %v219_v61, 0.0  ;;  %v252_v10 = vmax.f32 %v220_v62, 0.0  ;;  %v131_v61 = vmul.f32 %v553_v27, %v581_v45  ;;  %v133_v62 = vmul.f32 %v551_v26, %v581_v45 }
  0xaa   :  { %v585_v47 = vpop.permute.xlu0 %308 }
  0xab   :  { %v281_v50 = vpop.permute.xlu1 %280 }
  0xae   :  { %v589_v51 = vpop.permute.xlu0 %320 }
  0xb0   :  { %v169_v54 = vpop.permute.xlu1 %168 }
  0xb1   :  { %v223_v43 = vadd.f32 %v169_v54, %v127_v22  ;;  %v224_v48 = vadd.f32 %v169_v54, %v128_v38  ;;  %v132_v54 = vmul.f32 %v553_v27, %v583_v46 }
  0xb3   :  { %v153_v63 = vpop.permute.xlu0 %152 }
  0xb4   :  { %v215_v0 = vadd.f32 %v153_v63, %v119_v57  ;;  %v216_v1 = vadd.f32 %v153_v63, %v120_v58  ;;  %v255_v57 = vmax.f32 %v223_v43, 0.0  ;;  %v256_v58 = vmax.f32 %v224_v48, 0.0 }
  0xb5   :  { %v289_v2 = vpop.permute.xlu1 %288  ;;  %v134_v63 = vmul.f32 %v551_v26, %v583_v46 }
  0xb6   :  { %v247_v5 = vmax.f32 %v215_v0, 0.0  ;;  %v248_v6 = vmax.f32 %v216_v1, 0.0  ;;  %v347_v16 = vmul.f32 %v289_v2, %v251_v9  ;;  %v348_v17 = vmul.f32 %v289_v2, %v252_v10 }
  0xb7   :  { %v165_v11 = vpop.permute.xlu0 %164  ;;  %v351_v0 = vmul.f32 %v579_v44, %v255_v57  ;;  %v352_v24 = vmul.f32 %v579_v44, %v256_v58 }
  0xb8   :  { %v343_v12 = vmul.f32 %v281_v50, %v247_v5  ;;  %v344_v13 = vmul.f32 %v281_v50, %v248_v6  ;;  %v221_v14 = vadd.f32 %v165_v11, %v125_v3  ;;  %v222_v15 = vadd.f32 %v165_v11, %v126_v4 }
  0xb9   :  { %v293_v18 = vpop.permute.xlu1 %292 }
  0xba   :  { %v375_v19 = vadd.f32 %v345_v7, %v343_v12  ;;  %v396_v20 = vadd.f32 %v346_v8, %v344_v13  ;;  %v253_v21 = vmax.f32 %v221_v14, 0.0  ;;  %v254_v23 = vmax.f32 %v222_v15, 0.0 }
  0xbb   :  { %v173_v53 = vpop.permute.xlu0 %172 }
  0xbc   :  { %v376_v39 = vadd.f32 %v375_v19, %v347_v16  ;;  %v397_v40 = vadd.f32 %v396_v20, %v348_v17  ;;  %v349_v41 = vmul.f32 %v293_v18, %v253_v21  ;;  %v350_v42 = vmul.f32 %v293_v18, %v254_v23 }
  0xbd   :  { %v225_v59 = vadd.f32 %v173_v53, %v129_v55  ;;  %v226_v25 = vadd.f32 %v173_v53, %v130_v56 }
  0xbe   :  { %v377_v49 = vadd.f32 %v376_v39, %v349_v41  ;;  %v398_v50 = vadd.f32 %v397_v40, %v350_v42  ;;  %v177_v52 = vpop.permute.xlu1 %176  ;;  %v135_v40 = vmul.f32 %v557_v29, %v581_v45  ;;  %v136_v41 = vmul.f32 %v557_v29, %v583_v46 }
  0xbf   :  { %v227_v1 = vadd.f32 %v177_v52, %v131_v61  ;;  %v228_v2 = vadd.f32 %v177_v52, %v132_v54  ;;  %v257_v3 = vmax.f32 %v225_v59, 0.0  ;;  %v258_v4 = vmax.f32 %v226_v25, 0.0  ;;  %v185_v39 = vpop.permute.xlu0 %184 }
  0xc0   :  { %v378_v27 = vadd.f32 %v377_v49, %v351_v0  ;;  %v399_v10 = vadd.f32 %v398_v50, %v352_v24  ;;  %v231_v42 = vadd.f32 %v185_v39, %v135_v40  ;;  %v232_v43 = vadd.f32 %v185_v39, %v136_v41 }
  0xc1   :  { %v259_v11 = vmax.f32 %v227_v1, 0.0  ;;  %v260_v12 = vmax.f32 %v228_v2, 0.0  ;;  %v137_v49 = vmul.f32 %v555_v28, %v581_v45 }
  0xc2   :  { %v181_v60 = vpop.permute.xlu1 %180  ;;  %v263_v50 = vmax.f32 %v231_v42, 0.0  ;;  %v264_v52 = vmax.f32 %v232_v43, 0.0 }
  0xc3   :  { %v229_v5 = vadd.f32 %v181_v60, %v133_v62  ;;  %v230_v6 = vadd.f32 %v181_v60, %v134_v63  ;;  %v139_v63 = vmul.f32 %v561_v31, %v581_v45  ;;  %v197_v1 = vpop.permute.xlu0 %196 }
  0xc5   :  { %v261_v13 = vmax.f32 %v229_v5, 0.0  ;;  %v262_v14 = vmax.f32 %v230_v6, 0.0  ;;  %v141_v5 = vmul.f32 %v559_v30, %v581_v45  ;;  %v142_v6 = vmul.f32 %v559_v30, %v583_v46 }
  0xc7   :  { %v301_v7 = vpop.permute.xlu1 %300  ;;  %v357_v18 = vmul.f32 %v585_v47, %v261_v13  ;;  %v358_v19 = vmul.f32 %v585_v47, %v262_v14  ;;  %v138_v47 = vmul.f32 %v555_v28, %v583_v46  ;;  %v140_v28 = vmul.f32 %v561_v31, %v583_v46 }
  0xc8   :  { %v353_v8 = vmul.f32 %v301_v7, %v257_v3  ;;  %v354_v9 = vmul.f32 %v301_v7, %v258_v4  ;;  %v237_v7 = vadd.f32 %v197_v1, %v141_v5  ;;  %v143_v31 = vmul.f32 %v565_v33, %v581_v45 }
  0xc9   :  { %v146_v13 = vmul.f32 %v563_v32, %v583_v46 }
  0xca   :  { %v379_v26 = vadd.f32 %v378_v27, %v353_v8  ;;  %v400_v15 = vadd.f32 %v399_v10, %v354_v9  ;;  %v238_v8 = vadd.f32 %v197_v1, %v142_v6  ;;  %v269_v14 = vmax.f32 %v237_v7, 0.0 }
  0xcb   :  { %v305_v16 = vpop.permute.xlu1 %304 }
  0xcc   :  { %v355_v17 = vmul.f32 %v305_v16, %v259_v11  ;;  %v356_v44 = vmul.f32 %v305_v16, %v260_v12  ;;  %v144_v11 = vmul.f32 %v565_v33, %v583_v46  ;;  %v145_v12 = vmul.f32 %v563_v32, %v581_v45 }
  0xce   :  { %v380_v20 = vadd.f32 %v379_v26, %v355_v17  ;;  %v401_v21 = vadd.f32 %v400_v15, %v356_v44  ;;  %v270_v26 = vmax.f32 %v238_v8, 0.0 }
  0xd0   :  { %v189_v23 = vpop.permute.xlu1 %188  ;;  %v381_v22 = vadd.f32 %v380_v20, %v357_v18  ;;  %v402_v38 = vadd.f32 %v401_v21, %v358_v19  ;;  %v209_v19 = vpop.permute.xlu0 %208 }
  0xd1   :  { %v233_v53 = vadd.f32 %v189_v23, %v137_v49  ;;  %v234_v55 = vadd.f32 %v189_v23, %v138_v47 }
  0xd3   :  { %v265_v59 = vmax.f32 %v233_v53, 0.0  ;;  %v266_v25 = vmax.f32 %v234_v55, 0.0 }
  0xd4   :  { %v193_v48 = vpop.permute.xlu1 %192  ;;  %v333_v43 = vpop.permute.xlu0 %332 }
  0xd5   :  { %v235_v2 = vadd.f32 %v193_v48, %v139_v63  ;;  %v236_v3 = vadd.f32 %v193_v48, %v140_v28 }
  0xd7   :  { %v267_v9 = vmax.f32 %v235_v2, 0.0  ;;  %v268_v27 = vmax.f32 %v236_v3, 0.0 }
  0xd9   :  { %v313_v56 = vpop.permute.xlu1 %312  ;;  %v363_v16 = vmul.f32 %v589_v51, %v267_v9  ;;  %v364_v17 = vmul.f32 %v589_v51, %v268_v27  ;;  %v147_v51 = vmul.f32 %v569_v36, %v581_v45 }
  0xda   :  { %v359_v57 = vmul.f32 %v313_v56, %v263_v50  ;;  %v360_v58 = vmul.f32 %v313_v56, %v264_v52  ;;  %v148_v50 = vmul.f32 %v569_v36, %v583_v46 }
  0xdc   :  { %v382_v29 = vadd.f32 %v381_v22, %v359_v57  ;;  %v403_v61 = vadd.f32 %v402_v38, %v360_v58  ;;  %v243_v57 = vadd.f32 %v209_v19, %v147_v51  ;;  %v244_v58 = vadd.f32 %v209_v19, %v148_v50 }
  0xdd   :  { %v317_v60 = vpop.permute.xlu1 %316 }
  0xde   :  { %v361_v54 = vmul.f32 %v317_v60, %v265_v59  ;;  %v362_v62 = vmul.f32 %v317_v60, %v266_v25 }
  0xe0   :  { %v383_v0 = vadd.f32 %v382_v29, %v361_v54  ;;  %v404_v24 = vadd.f32 %v403_v61, %v362_v62  ;;  %v149_v29 = vmul.f32 %v567_v35, %v581_v45  ;;  %v150_v61 = vmul.f32 %v567_v35, %v583_v46 }
  0xe1   :  { %v275_v54 = vmax.f32 %v243_v57, 0.0  ;;  %v276_v62 = vmax.f32 %v244_v58, 0.0  ;;  %v477_v46 = vmov 1966171168  }
  0xe2   :  { %v201_v4 = vpop.permute.xlu1 %200  ;;  %v384_v23 = vadd.f32 %v383_v0, %v363_v16  ;;  %v405_v22 = vadd.f32 %v404_v24, %v364_v17  ;;  %v419_v16 = vpop.permute.xlu0 %418 }
  0xe3   :  { %v239_v30 = vadd.f32 %v201_v4, %v143_v31  ;;  %v240_v15 = vadd.f32 %v201_v4, %v144_v11  ;;  %v427_v31 = vunpack.c.l.s4 %v477_v46 }
  0xe5   :  { %v271_v38 = vmax.f32 %v239_v30, 0.0  ;;  %v272_v39 = vmax.f32 %v240_v15, 0.0 }
  0xe6   :  { %v205_v10 = vpop.permute.xlu1 %204 }
  0xe7   :  { %v241_v44 = vadd.f32 %v205_v10, %v145_v12  ;;  %v242_v18 = vadd.f32 %v205_v10, %v146_v13 }
  0xe9   :  { %v273_v40 = vmax.f32 %v241_v44, 0.0  ;;  %v274_v32 = vmax.f32 %v242_v18, 0.0 }
  0xeb   :  { %v325_v20 = vpop.permute.xlu1 %324  ;;  %v369_v52 = vmul.f32 %v333_v43, %v273_v40  ;;  %v370_v53 = vmul.f32 %v333_v43, %v274_v32 }
  0xec   :  { %v365_v21 = vmul.f32 %v325_v20, %v269_v14  ;;  %v366_v33 = vmul.f32 %v325_v20, %v270_v26  ;;  %v428_v26 = vunpack.c.0.s8 %v427_v31 }
  0xee   :  { %v385_v41 = vadd.f32 %v384_v23, %v365_v21  ;;  %v406_v42 = vadd.f32 %v405_v22, %v366_v33  ;;  %v431_v18 = vsub.s32 %v428_v26, %v572_v37 }
  0xef   :  { %v329_v48 = vpop.permute.xlu1 %328 }
  0xf0   :  { %v367_v49 = vmul.f32 %v329_v48, %v271_v38  ;;  %v368_v47 = vmul.f32 %v329_v48, %v272_v39 }
  0xf2   :  { %v386_v55 = vadd.f32 %v385_v41, %v367_v49  ;;  %v407_v56 = vadd.f32 %v406_v42, %v368_v47 }
  0xf4   :  { %v213_v59 = vpop.permute.xlu1 %212  ;;  %v387_v25 = vadd.f32 %v386_v55, %v369_v52  ;;  %v408_v60 = vadd.f32 %v407_v56, %v370_v53 }
  0xf5   :  { %v245_v63 = vadd.f32 %v213_v59, %v149_v29  ;;  %v246_v28 = vadd.f32 %v213_v59, %v150_v61 }
  0xf7   :  { %v277_v1 = vmax.f32 %v245_v63, 0.0  ;;  %v278_v2 = vmax.f32 %v246_v28, 0.0 }
  0xf9   :  { %v337_v36 = vpop.permute.xlu1 %336 }
  0xfa   :  { %v371_v0 = vmul.f32 %v337_v36, %v275_v54  ;;  %v372_v24 = vmul.f32 %v337_v36, %v276_v62 }
  0xfc   :  { %v388_v4 = vadd.f32 %v387_v25, %v371_v0  ;;  %v409_v5 = vadd.f32 %v408_v60, %v372_v24 }
  0xfd   :  { %v341_v3 = vpop.permute.xlu1 %340 }
  0xfe   :  { %v373_v6 = vmul.f32 %v341_v3, %v277_v1  ;;  %v374_v7 = vmul.f32 %v341_v3, %v278_v2 }
 0x100   :  { %v389_v8 = vadd.f32 %v388_v4, %v373_v6  ;;  %v410_v9 = vadd.f32 %v409_v5, %v374_v7 }
 0x102   :  { %v390_v45 = vrot.slane %v389_v8, 4  ;;  %v411_v27 = vrot.slane %v410_v9, 4 }
 0x104   :  { %v391_v10 = vadd.f32 %v390_v45, %v389_v8  ;;  %v412_v35 = vadd.f32 %v411_v27, %v410_v9 }
 0x106   :  { %v392_v11 = vrot.slane %v391_v10, 2  ;;  %v413_v12 = vrot.slane %v412_v35, 2 }
 0x108   :  { %v393_v13 = vadd.f32 %v392_v11, %v391_v10  ;;  %v414_v14 = vadd.f32 %v413_v12, %v412_v35 }
 0x10a   :  { %v394_v30 = vrot.slane %v393_v13, 1  ;;  %v415_v15 = vrot.slane %v414_v14, 1 }
 0x10c   :  { %v395_v17 = vadd.f32 %v394_v30, %v393_v13  ;;  %v416_v44 = vadd.f32 %v415_v15, %v414_v14 }
 0x10e   :  { %v421_v19 = vadd.f32 %v419_v16, %v395_v17  ;;  %v422_v20 = vadd.f32 %v419_v16, %v416_v44 }
 0x110   :  { %v425_v21 = vcombine.low %v421_v19, %v422_v20 }
 0x112   :  { %v432_v33 = vrot.slane %v425_v21, %v431_v18 }
 0x114   :  { %v439_v23 = vrot.slane %v432_v33, %v431_v18 }
 0x116   :  { %445 = vst.msk [vmem:[%s658_s2] sm:$0x3] %vm443_vm0, %v439_v23 }

</bundles_post_ra>
